<compile_context>
chip_gen: v5e
topology: v5e:2x2
jax: 0.10.0
libtpu: 0.0.40
codegen_flags: <defaults>
</compile_context>

<pallas_src>
import jax
import jax.numpy as jnp
from jax.experimental import pallas as pl
from jax.experimental.pallas import tpu as pltpu


def _mixtconv_fma_kernel(x_ref, w_ref, b_ref, o_ref):
    # x_ref: (R_TILE, T_TILE)   w_ref/b_ref: (R_TILE, 1)   o_ref: (R_TILE, T_TILE)
    # Single FMA == conv1(x)*4 + x of the original forward (weights pre-folded).
    o_ref[...] = (x_ref[...] * w_ref[...] + b_ref[...]).astype(o_ref.dtype)


def _round_up(v, m):
    return ((v + m - 1) // m) * m


_SUBLANE = {1: 32, 2: 16, 4: 8}  # itemsize -> native sublane multiple


def mixtconv_head(x, w1, b1, *, alias_input=False):
    """Forward of MixTConvHead.

    x:  (N, C, T) activations.
    w1: (C,) or (C, 1, 1) weight of the k=1 depthwise conv1.
    b1: (C,) bias of conv1.
    """
    N, C, T = x.shape
    R = N * C
    itemsize = jnp.dtype(x.dtype).itemsize
    sub = _SUBLANE.get(itemsize, 8)

    # Algebraic fold of the forward: 4*(w*x + b) + x == (4w + 1)*x + 4b.
    w_eff = 4.0 * w1.reshape(C).astype(jnp.float32) + 1.0
    b_eff = 4.0 * b1.reshape(C).astype(jnp.float32)

    # Flatten batch+channel onto the sublane axis; time on the lane axis.
    x2 = x.reshape(R, T)
    w_rows = jnp.tile(w_eff, N).reshape(R, 1)   # row r = n*C + c -> w_eff[c]
    b_rows = jnp.tile(b_eff, N).reshape(R, 1)

    # --- tile sizing: biggest lane-dense tiles that fit the VMEM budget -----
    try:
        vmem_cap = int(pltpu.get_tpu_info().vmem_capacity_bytes)
    except Exception:  # conservative fallback if the query is unavailable
        vmem_cap = 64 << 20
    # Per-tile budget: ~1/10 of physical VMEM, capped at 8 MiB.  With double-
    # buffered x-in + x-out this gives ~<=32 MiB working set on v5e/v6e
    # (128 MiB VMEM) and ~25 MiB on v7x (64 MiB VMEM).
    tile_budget = min(vmem_cap // 10, 8 << 20)

    T_TILE = min(_round_up(T, 128), 4096)                  # long, lane-dense DMAs
    max_rows = max(tile_budget // (T_TILE * itemsize), sub)
    R_TILE = min(_round_up(R, sub), (max_rows // sub) * sub)

    grid_r = pl.cdiv(R, R_TILE)
    grid_t = pl.cdiv(T, T_TILE)
    # Megacore: ensure >= 2 grid steps along a parallel axis when the shape
    # allows, so both TensorCores get work on v7x.
    if grid_r * grid_t < 2:
        if R > sub:
            R_TILE = _round_up(-(-R // 2), sub)
            grid_r = pl.cdiv(R, R_TILE)
        elif T > 128:
            T_TILE = _round_up(-(-T // 2), 128)
            grid_t = pl.cdiv(T, T_TILE)

    tile_bytes = R_TILE * T_TILE * itemsize
    wb_bytes = 2 * 2 * R_TILE * 128 * 4     # two f32 (R_TILE,1) blocks, 2-buffered, lane-padded
    vmem_limit = min(int(4 * tile_bytes + wb_bytes + (2 << 20)), vmem_cap)

    out2 = pl.pallas_call(
        _mixtconv_fma_kernel,
        out_shape=jax.ShapeDtypeStruct((R, T), x.dtype),
        grid_spec=pltpu.PrefetchScalarGridSpec(
            num_scalar_prefetch=0,
            grid=(grid_r, grid_t),
            in_specs=[
                pl.BlockSpec((R_TILE, T_TILE), lambda r, t: (r, t)),
                # w/b block index is constant along the fast (t) axis -> stays
                # resident in VMEM; refetched only when the row tile changes.
                pl.BlockSpec((R_TILE, 1), lambda r, t: (r, 0)),
                pl.BlockSpec((R_TILE, 1), lambda r, t: (r, 0)),
            ],
            out_specs=pl.BlockSpec((R_TILE, T_TILE), lambda r, t: (r, t)),
        ),
        compiler_params=pltpu.CompilerParams(
            dimension_semantics=("parallel", "parallel"),
            vmem_limit_bytes=vmem_limit,
        ),
        # Output matches the input's shape/dtype exactly; aliasing reuses the
        # input HBM buffer.  Only a win if x is donated at the jit boundary,
        # otherwise XLA inserts a defensive copy -> off by default.
        input_output_aliases=({0: 0} if alias_input else {}),
    )(x2, w_rows, b_rows)

    return out2.reshape(N, C, T)


def init_params(key, num_channels, split=1):
    """Deterministic synthetic init matching the module's parameter shapes."""
    C = num_channels // split
    keys = jax.random.split(key, 8)
    params = {}
    # conv1: depthwise Conv1d(C, C, k=1, groups=C) -> weight (C,1,1), bias (C,)
    params["conv1_w"] = jax.random.normal(keys[0], (C, 1, 1), jnp.float32) * 0.5
    params["conv1_b"] = jax.random.normal(keys[1], (C,), jnp.float32) * 0.1
    # conv2..conv4 exist in __init__ but are unused in forward (shape fidelity only)
    params["conv2_w"] = jax.random.normal(keys[2], (C, 1, 3), jnp.float32) * 0.5
    params["conv2_b"] = jax.random.normal(keys[3], (C,), jnp.float32) * 0.1
    params["conv3_w"] = jax.random.normal(keys[4], (C, 1, 5), jnp.float32) * 0.5
    params["conv3_b"] = jax.random.normal(keys[5], (C,), jnp.float32) * 0.1
    params["conv4_w"] = jax.random.normal(keys[6], (C, 1, 7), jnp.float32) * 0.5
    params["conv4_b"] = jax.random.normal(keys[7], (C,), jnp.float32) * 0.1
    return params


def _reference(x, w1, b1):
    # exact semantics of the original forward: conv1 applied 4x + residual
    y = x * w1[None, :, None] + b1[None, :, None]
    return y + y + y + y + x


if __name__ == "__main__":
    key = jax.random.PRNGKey(0)

    # Case 1: shapes implied by the module (batch=2, channels=4, time=16)
    num_channels, split = 4, 1
    N, C, T = 2, num_channels // split, 16
    k_x, k_p, k_x2 = jax.random.split(key, 3)
    x = jax.random.normal(k_x, (N, C, T), jnp.float32)
    params = init_params(k_p, num_channels, split)
    w1 = params["conv1_w"].reshape(C)
    b1 = params["conv1_b"]

    out = jax.block_until_ready(mixtconv_head(x, w1, b1))
    ref = _reference(x, w1, b1)
    assert out.shape == (N, C, T)
    assert jnp.allclose(out, ref, atol=1e-5, rtol=1e-5), "mismatch vs reference (small)"

    # Case 2: exercises partial edge tiles (T not 128-aligned) and the
    # megacore row-tile split path (no wrapper pad / slice anywhere).
    N2, C2, T2 = 2, 16, 300
    x_large = jax.random.normal(k_x2, (N2, C2, T2), jnp.float32)
    w1b = jax.random.normal(jax.random.PRNGKey(1), (C2,), jnp.float32) * 0.5
    b1b = jax.random.normal(jax.random.PRNGKey(2), (C2,), jnp.float32) * 0.1
    out2 = jax.block_until_ready(mixtconv_head(x_large, w1b, b1b))
    ref2 = _reference(x_large, w1b, b1b)
    assert out2.shape == (N2, C2, T2)
    assert jnp.allclose(out2, ref2, atol=1e-5, rtol=1e-5), "mismatch vs reference (large)"

    print("KERNEL_OK")
</pallas_src>

<mosaic_0001>
module attributes {stable_mosaic.version = 11 : i64} {
  func.func @_mixtconv_fma_kernel(%arg0: i32, %arg1: i32, %arg2: memref<8x128xf32, #tpu.memory_space<vmem>>, %arg3: memref<8x1xf32, #tpu.memory_space<vmem>>, %arg4: memref<8x1xf32, #tpu.memory_space<vmem>>, %arg5: memref<8x128xf32, #tpu.memory_space<vmem>>) attributes {dimension_semantics = [#tpu.dimension_semantics<parallel>, #tpu.dimension_semantics<parallel>], iteration_bounds = array<i64: 1, 1>, scalar_prefetch = 0 : i64, scratch_operands = 0 : i64, tpu.core_type = #tpu.core_type<tc>, window_params = [{transform_indices = @transform_0, window_bounds = array<i64: 8, 128>}, {transform_indices = @transform_1, window_bounds = array<i64: 8, 1>}, {transform_indices = @transform_2, window_bounds = array<i64: 8, 1>}, {transform_indices = @transform_3, window_bounds = array<i64: 8, 128>}]} {
    %c0 = arith.constant 0 : index
    %c0_0 = arith.constant 0 : index
    %0 = vector.load %arg2[%c0, %c0_0] : memref<8x128xf32, #tpu.memory_space<vmem>>, vector<8x128xf32>
    %c0_1 = arith.constant 0 : index
    %c0_2 = arith.constant 0 : index
    %1 = vector.load %arg3[%c0_1, %c0_2] : memref<8x1xf32, #tpu.memory_space<vmem>>, vector<8x1xf32>
    %2 = vector.broadcast %1 : vector<8x1xf32> to vector<8x128xf32>
    %3 = arith.mulf %0, %2 : vector<8x128xf32>
    %c0_3 = arith.constant 0 : index
    %c0_4 = arith.constant 0 : index
    %4 = vector.load %arg4[%c0_3, %c0_4] : memref<8x1xf32, #tpu.memory_space<vmem>>, vector<8x1xf32>
    %5 = vector.broadcast %4 : vector<8x1xf32> to vector<8x128xf32>
    %6 = arith.addf %3, %5 : vector<8x128xf32>
    %c0_5 = arith.constant 0 : index
    %c0_6 = arith.constant 0 : index
    %7 = vector.load %arg5[%c0_5, %c0_6] : memref<8x128xf32, #tpu.memory_space<vmem>>, vector<8x128xf32>
    tpu.vector_store %arg5[%c0_5, %c0_6], %6 {strides = array<i32>} : memref<8x128xf32, #tpu.memory_space<vmem>>, vector<8x128xf32>,
    return
  }
  func.func @transform_0(%arg0: i32, %arg1: i32) -> (i32, i32) {
    %c0_i32 = arith.constant 0 : i32
    return %arg0, %arg1 : i32, i32
  }
  func.func @transform_1(%arg0: i32, %arg1: i32) -> (i32, i32) {
    %c0_i32 = arith.constant 0 : i32
    %c0_i32_0 = arith.constant 0 : i32
    return %arg0, %c0_i32 : i32, i32
  }
  func.func @transform_2(%arg0: i32, %arg1: i32) -> (i32, i32) {
    %c0_i32 = arith.constant 0 : i32
    %c0_i32_0 = arith.constant 0 : i32
    return %arg0, %c0_i32 : i32, i32
  }
  func.func @transform_3(%arg0: i32, %arg1: i32) -> (i32, i32) {
    %c0_i32 = arith.constant 0 : i32
    return %arg0, %arg1 : i32, i32
  }
}

</mosaic_0001>

<bundles_post_ra>
// kernel: tpu_custom_call.1
= control target key start
LH: loop header
LB: loop body
LE: loop exit
PB: predicated region body
PF: predicated region fallthrough
CT: control target
= control target key end

     0   :  { %s110_s0 = inlined_call_operand.vmem [shape: f32[8,16], index: 0, kind: input, shape index: {}]   ;;  %s111_s1 = inlined_call_operand.vmem [shape: f32[8,1], index: 1, kind: input, shape index: {}]   ;;  %s112_s2 = inlined_call_operand.vmem [shape: f32[8,1], index: 2, kind: input, shape index: {}]   ;;  %s113_s3 = inlined_call_operand.hbm [shape: f32[8,16], index: 3, kind: output, shape index: {}]  }
   0x1   :  { %v16_v0 = vld [vmem:[%s111_s1] sm:$0xff] }
   0x2   :  { %8 = vsyncpa [#allocation3], 0  ;;  %v76_v1 = vmov 0   ;;  %v23_v2 = vld [vmem:[%s112_s2] sm:$0xff]  ;;  %s77_s18 = smov [#allocation2]   ;;  %s38_s1 = sshll.u32 %s113_s3, 4  ;;  %s39_s1 = int_to_ptr.hbm [resolvable:$true] %s38_s1 }
   0x3   :  { %49 = vset.pattern.permute.xlu0 %v76_v1  ;;  %v15_v4 = vld [vmem:[%s110_s0] sm:$0xff]  ;;  %s36_s19 = sshll.u32 %s77_s18, 4  ;;  %s37_s19 = int_to_ptr.vmem [resolvable:$true] %s36_s19 }
   0x4   :  { %19 = vperm.xlu0 %49, %v16_v0  }
   0xc   :  { %26 = vperm.xlu0 %49, %v23_v2  }
  0x76   :  { %v20_v3 = vpop.permute.xlu0 %19 }
  0x77   :  { %v22_v5 = vmul.f32 %v20_v3, %v15_v4 }
  0x7e   :  { %v27_v6 = vpop.permute.xlu0 %26 }
  0x7f   :  { %v29_v7 = vadd.f32 %v27_v6, %v22_v5 }
  0x81   :  { %30 = vst [vmem:[#allocation2] sm:$0xff] %v29_v7 }
  0x82   :  { %41 = dma.vmem_to_hbm [thread:$0]  %s37_s19, 128, %s39_s1, [#allocation3]  }
  0x83   :  { %74 = dma.done.wait [#allocation3], 128  }
  0x84   :  { %75 = vsyncadd [#allocation3], 4294967168 }
  0x85   :  { %46 = vsyncpa [#allocation3], 1 }

</bundles_post_ra>
